<compile_context>
chip_gen: v7x
topology: tpu7x:2x2x1
jax: 0.10.0
libtpu: 0.0.40
codegen_flags: <defaults>
</compile_context>

<pallas_src>
import functools

import jax
import jax.numpy as jnp
from jax.experimental import pallas as pl
from jax.experimental.pallas import tpu as pltpu

_LANE = 128
_SUBLANE = 8

# 4 MiB blocks keep the ~0.35 us per-grid-step overhead of this purely
# HBM-bound stream at <2% even on v7x (3.2 TB/s HBM).
_TARGET_BLOCK_BYTES = 4 << 20
# Below this many bytes per tensor, kernel launch cost dominates; let XLA fuse.
_MIN_PALLAS_BYTES = 1 << 20


def _tpu_physical_vmem_bytes():
    """Best-effort physical VMEM capacity; defaults to the smallest (v7x, 64 MiB)."""
    phys = 64 << 20
    try:
        info = pltpu.get_tpu_info()
        cap = getattr(info, "vmem_capacity_bytes", None)
        if cap:
            phys = int(cap)
    except Exception:  # non-TPU backend / interpret mode / older API
        pass
    return phys


def _vmem_budget_bytes():
    """Scoped-VMEM budget for the kernel's double-buffered streams.

    5/8 of physical VMEM: 40 MiB on v7x (64 MiB physical), 80 MiB on v5e/v6e
    (128 MiB physical), leaving the rest for compiler-internal scratch.  The
    matching vmem_limit_bytes is passed explicitly since the default scoped
    limit (16 MiB v5e, 32 MiB v6e/v7x) is smaller than this budget.
    """
    return min((_tpu_physical_vmem_bytes() * 5) // 8, 80 << 20)


def _num_tensorcores():
    """TensorCores per chip: 2 on v7x, 1 on v5e/v6e (conservative fallback 1)."""
    try:
        kind = jax.devices()[0].device_kind.lower()
        if "v7" in kind:
            return 2
    except Exception:
        pass
    return 1


def _sum_kernel(acc_dtype, *refs):
    """refs = (in_0, ..., in_{k-1}, out); out = sum(in_i) accumulated in acc_dtype."""
    out_ref = refs[-1]
    acc = refs[0][...].astype(acc_dtype)
    for r in refs[1:-1]:
        acc = acc + r[...].astype(acc_dtype)
    out_ref[...] = acc.astype(out_ref.dtype)


def _pick_lane_width(n, sub):
    """Largest multiple of 128 (<=2048) dividing n, preferring >= sub rows."""
    best = None
    for w in (2048, 1024, 512, 256, 128):
        if n % w == 0:
            if best is None:
                best = w
            if n // w >= sub:
                return w
    return best  # None if n is not a multiple of 128


def _pallas_sum(arrs, force_pallas=False, donate_first=True):
    """Elementwise sum of a list of same-shape/dtype arrays."""
    assert len(arrs) >= 1
    shape = arrs[0].shape
    dtype = arrs[0].dtype
    for a in arrs[1:]:
        assert a.shape == shape and a.dtype == dtype, (
            "MergeTwo: all merged tensors must share shape and dtype")

    k = len(arrs)
    if k == 1:
        return arrs[0]

    n = arrs[0].size
    itemsize = jnp.dtype(dtype).itemsize
    # Packed-dtype sublane tiling: 8 rows (f32), 16 (bf16/f16), 32 (int8/fp8).
    sub = max(_SUBLANE, 32 // itemsize)
    lane_w = _pick_lane_width(n, sub)

    small = n * itemsize < _MIN_PALLAS_BYTES
    if lane_w is None or (small and not force_pallas):
        # Ragged size (not a multiple of 128) or tiny tensors: a fused XLA
        # k-way add avoids padding copies and kernel-launch overhead.
        return functools.reduce(jnp.add, arrs)

    rows = n // lane_w
    # Zero-copy lane-dense 2D views (pure reshape of contiguous data).
    mats = [a.reshape(rows, lane_w) for a in arrs]

    n_cores = _num_tensorcores()
    vmem_budget = _vmem_budget_bytes()

    # (k inputs + 1 output), each double-buffered, must fit the scoped budget.
    block_bytes_cap = min(_TARGET_BLOCK_BYTES, vmem_budget // ((k + 1) * 2))
    rows_cap = max(sub, (block_bytes_cap // (lane_w * itemsize)) // sub * sub)

    if rows_cap >= rows:
        if n_cores > 1 and rows >= n_cores * sub:
            # One block per TensorCore (v7x megacore sharding).  On 1-TC chips
            # (v5e/v6e) keep a single block: splitting is pure per-step cost.
            per_core = pl.cdiv(rows, n_cores)
            tm = ((per_core + sub - 1) // sub) * sub
        else:
            tm = rows  # single block spanning the full array extent
    else:
        tm = rows_cap
        if n_cores > 1:
            # Prefer a step count divisible by the core count so neither
            # TensorCore idles on the last step (matters for small grids).
            t = rows_cap
            for _ in range(16):
                if t < sub:
                    break
                if pl.cdiv(rows, t) % n_cores == 0:
                    tm = t
                    break
                t -= sub
    grid = (pl.cdiv(rows, tm),)

    block = pl.BlockSpec((tm, lane_w), lambda r: (r, 0))

    acc_dtype = (jnp.float32
                 if (jnp.issubdtype(dtype, jnp.floating) and itemsize < 4)
                 else dtype)

    cost = pl.CostEstimate(
        flops=(k - 1) * n,
        transcendentals=0,
        bytes_accessed=(k + 1) * n * itemsize,
    )

    # Scoped limit must cover the double-buffered blocks actually allocated
    # (plus a little headroom for compiler-internal scratch).
    vmem_usage = 2 * (k + 1) * tm * lane_w * itemsize
    vmem_limit = max(32 << 20, min(vmem_budget, vmem_usage + (8 << 20)))

    out = pl.pallas_call(
        functools.partial(_sum_kernel, acc_dtype),
        out_shape=jax.ShapeDtypeStruct((rows, lane_w), dtype),
        grid=grid,
        in_specs=[block] * k,
        out_specs=block,
        # Reuse the first merged tensor's buffer.  This only avoids a fresh
        # HBM allocation when the caller jits merge_two and tensors[i] is dead
        # afterwards; otherwise XLA inserts a defensive copy (still correct).
        input_output_aliases=({0: 0} if donate_first else {}),
        compiler_params=pltpu.CompilerParams(
            dimension_semantics=("parallel",),
            vmem_limit_bytes=vmem_limit),
        cost_estimate=cost,
    )(*mats)

    return out.reshape(shape)


def merge_two(tensors, i: int, j: int, force_pallas: bool = False,
              donate_first: bool = True):
    """JAX/Pallas equivalent of MergeTwo(i, j).forward(tensors).

    For the in-place alias on tensors[i] to take effect, call this under the
    caller's jit with tensors[i] not used afterwards; set donate_first=False
    to skip the alias entirely.
    """
    group = list(tensors[i:j + 1])
    merged = _pallas_sum(group, force_pallas=force_pallas,
                         donate_first=donate_first)
    return tuple(tensors[:i]) + (merged,) + tuple(tensors[j + 1:])


if __name__ == "__main__":
    key = jax.random.PRNGKey(0)
    shape = (2, 4, 16, 16)  # small NCHW, as a conv-pipeline branch merge sees
    keys = jax.random.split(key, 4)
    tensors = tuple(
        jax.random.normal(k, shape, dtype=jnp.float32) for k in keys
    )

    i, j = 1, 3  # merge tensors[1] + tensors[2] + tensors[3]
    ref_merged = tensors[1] + tensors[2] + tensors[3]

    # force_pallas=True so the kernel path is exercised even at this tiny size
    # (production use would let the <1 MiB bypass route it to fused XLA add).
    out = merge_two(tensors, i, j, force_pallas=True)
    out = jax.tree_util.tree_map(jax.block_until_ready, out)

    assert len(out) == len(tensors) - (j - i)
    assert jnp.allclose(out[i], ref_merged, atol=1e-6, rtol=1e-6)
    assert jnp.array_equal(out[0], tensors[0])

    # bf16 path: checks packed-dtype (16-row) tiling + f32 accumulation.
    t_bf16 = tuple(t.astype(jnp.bfloat16) for t in tensors)
    ref_bf16 = (t_bf16[1].astype(jnp.float32)
                + t_bf16[2].astype(jnp.float32)
                + t_bf16[3].astype(jnp.float32)).astype(jnp.bfloat16)
    out_bf16 = merge_two(t_bf16, i, j, force_pallas=True)
    out_bf16 = jax.tree_util.tree_map(jax.block_until_ready, out_bf16)
    assert jnp.allclose(out_bf16[i].astype(jnp.float32),
                        ref_bf16.astype(jnp.float32), atol=1e-2, rtol=1e-2)

    print("KERNEL_OK")
</pallas_src>

<mosaic_0001>
module attributes {stable_mosaic.version = 11 : i64} {
  func.func @_sum_kernel(%arg0: i32, %arg1: memref<8x256xf32, #tpu.memory_space<vmem>>, %arg2: memref<8x256xf32, #tpu.memory_space<vmem>>, %arg3: memref<8x256xf32, #tpu.memory_space<vmem>>, %arg4: memref<8x256xf32, #tpu.memory_space<vmem>>) attributes {dimension_semantics = [#tpu.dimension_semantics<parallel>], iteration_bounds = array<i64: 1>, scalar_prefetch = 0 : i64, scratch_operands = 0 : i64, tpu.core_type = #tpu.core_type<tc>, window_params = [{transform_indices = @transform_0, window_bounds = array<i64: 8, 256>}, {transform_indices = @transform_1, window_bounds = array<i64: 8, 256>}, {transform_indices = @transform_2, window_bounds = array<i64: 8, 256>}, {transform_indices = @transform_3, window_bounds = array<i64: 8, 256>}]} {
    %c0 = arith.constant 0 : index
    %c0_0 = arith.constant 0 : index
    %0 = vector.load %arg1[%c0, %c0_0] : memref<8x256xf32, #tpu.memory_space<vmem>>, vector<8x256xf32>
    %c0_1 = arith.constant 0 : index
    %c0_2 = arith.constant 0 : index
    %1 = vector.load %arg2[%c0_1, %c0_2] : memref<8x256xf32, #tpu.memory_space<vmem>>, vector<8x256xf32>
    %2 = arith.addf %0, %1 : vector<8x256xf32>
    %c0_3 = arith.constant 0 : index
    %c0_4 = arith.constant 0 : index
    %3 = vector.load %arg3[%c0_3, %c0_4] : memref<8x256xf32, #tpu.memory_space<vmem>>, vector<8x256xf32>
    %4 = arith.addf %2, %3 : vector<8x256xf32>
    %c0_5 = arith.constant 0 : index
    %c0_6 = arith.constant 0 : index
    %5 = vector.load %arg4[%c0_5, %c0_6] : memref<8x256xf32, #tpu.memory_space<vmem>>, vector<8x256xf32>
    tpu.vector_store %arg4[%c0_5, %c0_6], %4 {strides = array<i32>} : memref<8x256xf32, #tpu.memory_space<vmem>>, vector<8x256xf32>,
    return
  }
  func.func @transform_0(%arg0: i32) -> (i32, i32) {
    %c0_i32 = arith.constant 0 : i32
    %c0_i32_0 = arith.constant 0 : i32
    return %arg0, %c0_i32 : i32, i32
  }
  func.func @transform_1(%arg0: i32) -> (i32, i32) {
    %c0_i32 = arith.constant 0 : i32
    %c0_i32_0 = arith.constant 0 : i32
    return %arg0, %c0_i32 : i32, i32
  }
  func.func @transform_2(%arg0: i32) -> (i32, i32) {
    %c0_i32 = arith.constant 0 : i32
    %c0_i32_0 = arith.constant 0 : i32
    return %arg0, %c0_i32 : i32, i32
  }
  func.func @transform_3(%arg0: i32) -> (i32, i32) {
    %c0_i32 = arith.constant 0 : i32
    %c0_i32_0 = arith.constant 0 : i32
    return %arg0, %c0_i32 : i32, i32
  }
}

</mosaic_0001>

<bundles_post_ra>
// kernel: tpu_custom_call.1
= control target key start
LH: loop header
LB: loop body
LE: loop exit
PB: predicated region body
PF: predicated region fallthrough
CT: control target
= control target key end

     0   :  { %8 = vsyncpa [#allocation3], 0  ;;  %s162_s0 = inlined_call_operand.hbm [shape: f32[8,256], index: 0, kind: input, shape index: {}, may-alias: {0,3}]   ;;  %s163_s1 = inlined_call_operand.vmem [shape: f32[8,256], index: 1, kind: input, shape index: {}]   ;;  %s164_s2 = inlined_call_operand.vmem [shape: f32[8,256], index: 2, kind: input, shape index: {}]   ;;  %s165_s3 = inlined_call_operand.hbm [shape: f32[8,256], index: 3, kind: output, shape index: {}, may-alias: {0,3}]  }
   0x1   :  { %9 = vsyncpa [#allocation4], 0  ;;  %s104_s12 = smov [#allocation2]   ;;  %s56_s16 = scalar_lea.hbm %s162_s0, 256 }
   0x2   :  { %s16_s13 = sshll.u32 %s104_s12, 4  ;;  %p57_p0 = scmp.ne.s32.totalorder %s162_s0, %s56_s16  ;;  %s17_s13 = int_to_ptr.vmem [resolvable:$true] %s16_s13 }
   0x3   :  { %p60_p1 = scmp.lt.u32.totalorder %s56_s16, %s162_s0 }
   0x5   :  { %p62_p2 = pnand %p60_p1, %p57_p0 }
   0x7   :  { %65 = shalt.err (!%p62_p2)
}
   0x8   :  { %s66_s21 = scalar_lea.vmem %s17_s13, 256  ;;  %p71_p4 = scmp.lt.s32.totalorder %s17_s13, %s17_s13 }
   0x9   :  { %p67_p3 = scmp.ne.s32.totalorder %s17_s13, %s66_s21  ;;  %p72_p5 = scmp.lt.s32.totalorder %s66_s21, %s66_s21 }
   0xb   :  { %p73_p6 = por %p72_p5, %p71_p4 }
   0xd   :  { %p74_p7 = pnand %p73_p6, %p67_p3 }
   0xf   :  { %77 = shalt.err (!%p74_p7)
}
  0x10   :  { %19 = dma.hbm_to_vmem [thread:$0]  %s162_s0, 256, %s17_s13, [#allocation3]  }
  0x11   :  { %100 = dma.done.wait [#allocation3], 256  }
  0x12   :  { %101 = vsyncadd [#allocation3], 4294967040  ;;  %v27_v0 = vld [vmem:[#allocation2] sm:$0xff]  ;;  %v28_v4 = vld [vmem:[#allocation2 + $0x8] sm:$0xff]  ;;  %s105_s0 = smov [#allocation5]  }
  0x13   :  { %v29_v1 = vld [vmem:[%s163_s1] sm:$0xff]  ;;  %v30_v5 = vld [vmem:[%s163_s1 + $0x8] sm:$0xff]  ;;  %s45_s5 = sshll.u32 %s105_s0, 4  ;;  %s46_s5 = int_to_ptr.vmem [resolvable:$true] %s45_s5 }
  0x14   :  { %v33_v2 = vld [vmem:[%s164_s2] sm:$0xff]  ;;  %v31_v3 = vadd.f32 %v29_v1, %v27_v0  ;;  %v34_v6 = vld [vmem:[%s164_s2 + $0x8] sm:$0xff]  ;;  %v32_v7 = vadd.f32 %v30_v5, %v28_v4  ;;  %s78_s6 = scalar_lea.vmem %s46_s5, 256  ;;  %p83_p9 = scmp.lt.s32.totalorder %s46_s5, %s46_s5 }
  0x15   :  { %p79_p8 = scmp.ne.s32.totalorder %s46_s5, %s78_s6  ;;  %p84_p10 = scmp.lt.s32.totalorder %s78_s6, %s78_s6 }
  0x16   :  { %v35_v8 = vadd.f32 %v33_v2, %v31_v3  ;;  %v36_v9 = vadd.f32 %v34_v6, %v32_v7 }
  0x17   :  { %p85_p11 = por %p84_p10, %p83_p9 }
  0x18   :  { %37 = vst [vmem:[#allocation5] sm:$0xff] %v35_v8  ;;  %38 = vst [vmem:[#allocation5 + $0x8] sm:$0xff] %v36_v9 }
  0x19   :  { %p86_p12 = pnand %p85_p11, %p79_p8 }
  0x1b   :  { %89 = shalt.err (!%p86_p12)
}
  0x1c   :  { %s90_s8 = scalar_lea.hbm %s165_s3, 256 }
  0x1d   :  { %p91_p13 = scmp.ne.s32.totalorder %s165_s3, %s90_s8  ;;  %p94_p0 = scmp.lt.u32.totalorder %s90_s8, %s165_s3 }
  0x1f   :  { %p96_p1 = pnand %p94_p0, %p91_p13 }
  0x21   :  { %99 = shalt.err (!%p96_p1)
}
  0x22   :  { %48 = dma.vmem_to_hbm [thread:$0]  %s46_s5, 256, %s165_s3, [#allocation4]  }
  0x23   :  { %102 = dma.done.wait [#allocation4], 256  }
  0x24   :  { %103 = vsyncadd [#allocation4], 4294967040 }
  0x25   :  { %52 = vsyncpa [#allocation3], 1 }
  0x26   :  { %53 = vsyncpa [#allocation4], 1 }

</bundles_post_ra>
